<compile_context>
chip_gen: v7x
topology: tpu7x:2x2x1
jax: 0.10.0
libtpu: 0.0.40
codegen_flags: <defaults>
</compile_context>

<pallas_src>
import functools

import jax
import jax.numpy as jnp
from jax.experimental import pallas as pl
from jax.experimental.pallas import tpu as pltpu

_LANE_PAD = 128  # lane-dense padded width for the 3-wide linear output


def _predictor_kernel(x_ref, h0_ref, c0_ref,
                      w_ih_t_ref, w_hh_t_ref, b_ref,
                      w_lin_t_ref, b_lin_ref,
                      out_ref,
                      xg_scr, h_all_scr,
                      *, seq_len, batch, hidden_size):
    """Single-invocation kernel: whole LSTM recurrence + tanh + padded linear.

    x_ref       : (S*B, I)   pre-flattened input sequence (VMEM resident)
    h0_ref/c0_ref: (B, H)    initial state (leading 1 squeezed in the wrapper)
    w_ih_t_ref  : (I, 4H)    transposed weight_ih_l0
    w_hh_t_ref  : (H, 4H)    transposed weight_hh_l0
    b_ref       : (1, 4H)    b_ih + b_hh
    w_lin_t_ref : (H, 128)   transposed linear weight, zero-padded 3 -> 128
    b_lin_ref   : (1, 128)   linear bias, zero-padded 3 -> 128
    out_ref     : (S*B, 128) lane-dense projected output (cols 3: are zero)
    xg_scr      : (S*B, 4H)  precomputed x-path gate contributions
    h_all_scr   : (S*B, H)   all hidden states (for the batched projection)
    """
    S, B, H = seq_len, batch, hidden_size

    # ---- hoisted input-path matmul: every time step at once, bias folded in ----
    xg_scr[...] = jnp.dot(x_ref[...], w_ih_t_ref[...],
                          preferred_element_type=jnp.float32) + b_ref[...]

    # ---- hoisted reads (no per-iteration ref re-reads / re-broadcast) ----
    w_hh = w_hh_t_ref[...]                                           # (H, 4H)
    h0 = h0_ref[...]                                                 # (B, H)
    c0 = c0_ref[...]                                                 # (B, H)

    def step(t, carry):
        h_prev, c_prev = carry
        row = pl.multiple_of(t * B, B)
        # only the h-path matmul is serially dependent
        gates = xg_scr[pl.ds(row, B), :] + jnp.dot(
            h_prev, w_hh, preferred_element_type=jnp.float32)        # (B, 4H)

        # Two full-width EUP passes over the 4H = 128-lane vreg instead of
        # four narrow per-gate transcendentals.
        sig = jax.nn.sigmoid(gates)                                  # (B, 4H)
        th = jnp.tanh(gates)                                         # (B, 4H)

        # PyTorch gate order: input, forget, cell(g), output
        i_g = sig[:, 0 * H:1 * H]
        f_g = sig[:, 1 * H:2 * H]
        g_g = th[:, 2 * H:3 * H]
        o_g = sig[:, 3 * H:4 * H]

        c_new = f_g * c_prev + i_g * g_g
        h_new = o_g * jnp.tanh(c_new)
        h_all_scr[pl.ds(row, B), :] = h_new
        return h_new, c_new

    # S=8: full unroll fits easily in 64 vregs; cap unroll if S grows past ~32.
    jax.lax.fori_loop(0, S, step, (h0, c0), unroll=True)

    # ---- dropout (eval = identity), tanh, one batched lane-dense projection ----
    act = jnp.tanh(h_all_scr[...])                                   # (S*B, H)
    proj = jnp.dot(act, w_lin_t_ref[...],
                   preferred_element_type=jnp.float32) + b_lin_ref[...]
    out_ref[...] = proj.astype(out_ref.dtype)


def predictor_forward(x_bbm, h, x_beras, params):
    """JAX wrapper matching Predictor.forward(x_bbm, h, x_beras)."""
    del x_beras  # unused in the reference forward
    h0, c0 = h                      # each (1, B, H)
    S, B, I = x_bbm.shape
    H = params["w_hh_t"].shape[0]
    P = params["w_lin_pad_t"].shape[1]   # padded projection width (128)

    # Flatten / squeeze OUTSIDE the kernel (free XLA reshapes, fuse under jit)
    # so the kernel never does (S,B,*) <-> (S*B,*) relayouts.
    x_flat = x_bbm.reshape(S * B, I)
    h0_2d = h0.reshape(B, H)
    c0_2d = c0.reshape(B, H)

    kernel = functools.partial(_predictor_kernel,
                               seq_len=S, batch=B, hidden_size=H)

    # Advisory cost estimate so XLA schedules neighbors around the tiny call.
    flops = (2 * S * B * I * 4 * H          # hoisted input-path matmul
             + 2 * S * B * H * 4 * H        # recurrent matmuls
             + 2 * S * B * H * P            # hoisted projection
             + 16 * S * B * H)              # gate elementwise
    transcendentals = S * B * (2 * 4 * H + H) + S * B * H
    bytes_accessed = 4 * (S * B * I + 2 * B * H + I * 4 * H + H * 4 * H
                          + 4 * H + H * P + P + S * B * P)
    cost = pl.CostEstimate(flops=flops, transcendentals=transcendentals,
                           bytes_accessed=bytes_accessed)

    out_pad = pl.pallas_call(
        kernel,
        out_shape=jax.ShapeDtypeStruct((S * B, P), jnp.float32),
        grid_spec=pltpu.PrefetchScalarGridSpec(
            num_scalar_prefetch=0,
            grid=(1,),                                       # single invocation
            in_specs=[
                pl.BlockSpec((S * B, I), lambda i: (0, 0)),          # x (flat)
                pl.BlockSpec((B, H), lambda i: (0, 0)),              # h0
                pl.BlockSpec((B, H), lambda i: (0, 0)),              # c0
                pl.BlockSpec((I, 4 * H), lambda i: (0, 0)),          # W_ih^T
                pl.BlockSpec((H, 4 * H), lambda i: (0, 0)),          # W_hh^T
                pl.BlockSpec((1, 4 * H), lambda i: (0, 0)),          # bias
                pl.BlockSpec((H, P), lambda i: (0, 0)),              # W_lin^T (padded)
                pl.BlockSpec((1, P), lambda i: (0, 0)),              # b_lin (padded)
            ],
            out_specs=pl.BlockSpec((S * B, P), lambda i: (0, 0)),
            scratch_shapes=[
                pltpu.VMEM((S * B, 4 * H), jnp.float32),  # x-path gate contributions
                pltpu.VMEM((S * B, H), jnp.float32),      # all hidden states
            ],
        ),
        compiler_params=pltpu.CompilerParams(
            dimension_semantics=("arbitrary",),   # recurrence is sequential
        ),
        cost_estimate=cost,
    )(x_flat, h0_2d, c0_2d,
      params["w_ih_t"], params["w_hh_t"], params["b"],
      params["w_lin_pad_t"], params["b_lin_pad"])

    # slice away the lane padding, restore (S, B, 3), match PyTorch .squeeze()
    out = out_pad[:, :3].reshape(S, B, 3)
    return jnp.squeeze(out)


def init_params(key, input_size, hidden_size, lane_pad=_LANE_PAD):
    """Deterministic parameter init (PyTorch-style uniform(-1/sqrt(H), 1/sqrt(H)))."""
    ks = jax.random.split(key, 6)
    bound = 1.0 / jnp.sqrt(hidden_size)
    u = lambda k, shape: jax.random.uniform(k, shape, jnp.float32, -bound, bound)
    w_ih = u(ks[0], (4 * hidden_size, input_size))    # PyTorch weight_ih_l0
    w_hh = u(ks[1], (4 * hidden_size, hidden_size))   # PyTorch weight_hh_l0
    b_ih = u(ks[2], (4 * hidden_size,))
    b_hh = u(ks[3], (4 * hidden_size,))
    w_lin = u(ks[4], (3, hidden_size))                # nn.Linear(hidden, 3)
    b_lin = u(ks[5], (3,))

    # zero-pad the 3-wide projection to 128 output lanes (lane-dense stores)
    w_lin_pad_t = jnp.zeros((hidden_size, lane_pad), jnp.float32).at[:, :3].set(w_lin.T)
    b_lin_pad = jnp.zeros((1, lane_pad), jnp.float32).at[0, :3].set(b_lin)

    return {
        "w_ih_t": w_ih.T,                             # (I, 4H)
        "w_hh_t": w_hh.T,                             # (H, 4H)
        "b": (b_ih + b_hh).reshape(1, 4 * hidden_size),
        "w_lin_pad_t": w_lin_pad_t,                   # (H, 128)
        "b_lin_pad": b_lin_pad,                       # (1, 128)
    }


def _reference_forward(x_bbm, h, params):
    """Pure-JAX reference (PyTorch LSTM semantics) for a correctness check."""
    h0, c0 = h
    S, B, _ = x_bbm.shape
    H = params["w_hh_t"].shape[0]
    w_ih_t, w_hh_t, b = params["w_ih_t"], params["w_hh_t"], params["b"]
    h_t, c_t = h0[0], c0[0]
    hs = []
    for t in range(S):
        gates = x_bbm[t] @ w_ih_t + h_t @ w_hh_t + b
        i_g = jax.nn.sigmoid(gates[:, 0 * H:1 * H])
        f_g = jax.nn.sigmoid(gates[:, 1 * H:2 * H])
        g_g = jnp.tanh(gates[:, 2 * H:3 * H])
        o_g = jax.nn.sigmoid(gates[:, 3 * H:4 * H])
        c_t = f_g * c_t + i_g * g_g
        h_t = o_g * jnp.tanh(c_t)
        hs.append(h_t)
    act = jnp.tanh(jnp.stack(hs))                            # (S, B, H)
    w_lin_t = params["w_lin_pad_t"][:, :3]
    b_lin = params["b_lin_pad"][0, :3]
    return jnp.squeeze(act @ w_lin_t + b_lin)


if __name__ == "__main__":
    key = jax.random.PRNGKey(0)
    k_x, k_h, k_c, k_p = jax.random.split(key, 4)

    SEQ, BATCH, INPUT, HIDDEN = 8, 2, 16, 32   # small shapes; num_layers = 1

    x_bbm = jax.random.normal(k_x, (SEQ, BATCH, INPUT), jnp.float32)
    h0 = jax.random.normal(k_h, (1, BATCH, HIDDEN), jnp.float32)
    c0 = jax.random.normal(k_c, (1, BATCH, HIDDEN), jnp.float32)
    x_beras = jnp.zeros((BATCH,), jnp.float32)   # unused by forward, kept for signature parity

    params = init_params(k_p, INPUT, HIDDEN)

    # One jit over the whole forward so the post-kernel slice/reshape fuses.
    fwd = jax.jit(predictor_forward)
    out = fwd(x_bbm, (h0, c0), x_beras, params)
    jax.block_until_ready(out)
    assert out.shape == (SEQ, BATCH, 3), out.shape

    ref = _reference_forward(x_bbm, (h0, c0), params)
    assert jnp.allclose(out, ref, atol=2e-2, rtol=2e-2), \
        float(jnp.max(jnp.abs(out - ref)))

    print("KERNEL_OK")
</pallas_src>

<mosaic_0001>
module attributes {stable_mosaic.version = 11 : i64} {
  func.func @_predictor_kernel(%arg0: i32, %arg1: memref<16x16xf32, #tpu.memory_space<vmem>>, %arg2: memref<2x32xf32, #tpu.memory_space<vmem>>, %arg3: memref<2x32xf32, #tpu.memory_space<vmem>>, %arg4: memref<16x128xf32, #tpu.memory_space<vmem>>, %arg5: memref<32x128xf32, #tpu.memory_space<vmem>>, %arg6: memref<1x128xf32, #tpu.memory_space<vmem>>, %arg7: memref<32x128xf32, #tpu.memory_space<vmem>>, %arg8: memref<1x128xf32, #tpu.memory_space<vmem>>, %arg9: memref<16x128xf32, #tpu.memory_space<vmem>>, %arg10: memref<16x128xf32, #tpu.memory_space<vmem>>, %arg11: memref<16x32xf32, #tpu.memory_space<vmem>>) attributes {dimension_semantics = [#tpu.dimension_semantics<arbitrary>], iteration_bounds = array<i64: 1>, scalar_prefetch = 0 : i64, scratch_operands = 2 : i64, tpu.core_type = #tpu.core_type<tc>, window_params = [{pipeline_mode = #tpu.pipeline_mode<synchronous>, transform_indices = @transform_0, window_bounds = array<i64: 16, 16>}, {pipeline_mode = #tpu.pipeline_mode<synchronous>, transform_indices = @transform_1, window_bounds = array<i64: 2, 32>}, {pipeline_mode = #tpu.pipeline_mode<synchronous>, transform_indices = @transform_2, window_bounds = array<i64: 2, 32>}, {pipeline_mode = #tpu.pipeline_mode<synchronous>, transform_indices = @transform_3, window_bounds = array<i64: 16, 128>}, {pipeline_mode = #tpu.pipeline_mode<synchronous>, transform_indices = @transform_4, window_bounds = array<i64: 32, 128>}, {pipeline_mode = #tpu.pipeline_mode<synchronous>, transform_indices = @transform_5, window_bounds = array<i64: 1, 128>}, {pipeline_mode = #tpu.pipeline_mode<synchronous>, transform_indices = @transform_6, window_bounds = array<i64: 32, 128>}, {pipeline_mode = #tpu.pipeline_mode<synchronous>, transform_indices = @transform_7, window_bounds = array<i64: 1, 128>}, {pipeline_mode = #tpu.pipeline_mode<synchronous>, transform_indices = @transform_8, window_bounds = array<i64: 16, 128>}]} {
    %c0 = arith.constant 0 : index
    %c0_0 = arith.constant 0 : index
    %0 = vector.load %arg1[%c0, %c0_0] : memref<16x16xf32, #tpu.memory_space<vmem>>, vector<16x16xf32>
    %c0_1 = arith.constant 0 : index
    %c0_2 = arith.constant 0 : index
    %1 = vector.load %arg4[%c0_1, %c0_2] : memref<16x128xf32, #tpu.memory_space<vmem>>, vector<16x128xf32>
    %cst = arith.constant dense<0.000000e+00> : vector<16x128xf32>
    %2 = tpu.matmul %0, %1, %cst {dimension_numbers = #tpu.dot_dimension_numbers<[1], [0], [0], [1], [0, 0, 1, 1], [], []>} : vector<16x16xf32>, vector<16x128xf32>, vector<16x128xf32> -> vector<16x128xf32>
    %c0_3 = arith.constant 0 : index
    %c0_4 = arith.constant 0 : index
    %3 = vector.load %arg6[%c0_3, %c0_4] : memref<1x128xf32, #tpu.memory_space<vmem>>, vector<1x128xf32>
    %4 = vector.broadcast %3 : vector<1x128xf32> to vector<16x128xf32>
    %5 = arith.addf %2, %4 : vector<16x128xf32>
    %c0_5 = arith.constant 0 : index
    %c0_6 = arith.constant 0 : index
    %6 = vector.load %arg10[%c0_5, %c0_6] : memref<16x128xf32, #tpu.memory_space<vmem>>, vector<16x128xf32>
    tpu.vector_store %arg10[%c0_5, %c0_6], %5 {strides = array<i32>} : memref<16x128xf32, #tpu.memory_space<vmem>>, vector<16x128xf32>,
    %c0_7 = arith.constant 0 : index
    %c0_8 = arith.constant 0 : index
    %7 = vector.load %arg5[%c0_7, %c0_8] : memref<32x128xf32, #tpu.memory_space<vmem>>, vector<32x128xf32>
    %c0_9 = arith.constant 0 : index
    %c0_10 = arith.constant 0 : index
    %8 = vector.load %arg2[%c0_9, %c0_10] : memref<2x32xf32, #tpu.memory_space<vmem>>, vector<2x32xf32>
    %c0_11 = arith.constant 0 : index
    %c0_12 = arith.constant 0 : index
    %9 = vector.load %arg3[%c0_11, %c0_12] : memref<2x32xf32, #tpu.memory_space<vmem>>, vector<2x32xf32>
    %c0_i32 = arith.constant 0 : i32
    %c2_i32 = arith.constant 2 : i32
    %10 = arith.muli %c0_i32, %c2_i32 : i32
    %11 = tpu.assume_multiple %10, 2 : i32
    %12 = arith.index_cast %11 : i32 to index
    %c0_13 = arith.constant 0 : index
    %13 = vector.load %arg10[%12, %c0_13] : memref<16x128xf32, #tpu.memory_space<vmem>>, vector<2x128xf32>
    %cst_14 = arith.constant dense<0.000000e+00> : vector<2x128xf32>
    %14 = tpu.matmul %8, %7, %cst_14 {dimension_numbers = #tpu.dot_dimension_numbers<[1], [0], [0], [1], [0, 0, 1, 1], [], []>} : vector<2x32xf32>, vector<32x128xf32>, vector<2x128xf32> -> vector<2x128xf32>
    %15 = arith.addf %13, %14 : vector<2x128xf32>
    %16 = arith.negf %15 : vector<2x128xf32>
    %17 = math.exp %16 : vector<2x128xf32>
    %cst_15 = arith.constant 1.000000e+00 : f32
    %18 = vector.broadcast %cst_15 : f32 to vector<2x128xf32>
    %19 = arith.addf %18, %17 : vector<2x128xf32>
    %20 = arith.divf %18, %19 : vector<2x128xf32>
    %21 = math.tanh %15 : vector<2x128xf32>
    %22 = vector.extract_strided_slice %20 {offsets = [0, 0], sizes = [2, 32], strides = [1, 1]} : vector<2x128xf32> to vector<2x32xf32>
    %23 = vector.extract_strided_slice %20 {offsets = [0, 32], sizes = [2, 32], strides = [1, 1]} : vector<2x128xf32> to vector<2x32xf32>
    %24 = vector.extract_strided_slice %21 {offsets = [0, 64], sizes = [2, 32], strides = [1, 1]} : vector<2x128xf32> to vector<2x32xf32>
    %25 = vector.extract_strided_slice %20 {offsets = [0, 96], sizes = [2, 32], strides = [1, 1]} : vector<2x128xf32> to vector<2x32xf32>
    %26 = arith.mulf %23, %9 : vector<2x32xf32>
    %27 = arith.mulf %22, %24 : vector<2x32xf32>
    %28 = arith.addf %26, %27 : vector<2x32xf32>
    %29 = math.tanh %28 : vector<2x32xf32>
    %30 = arith.mulf %25, %29 : vector<2x32xf32>
    %31 = arith.index_cast %11 : i32 to index
    %c0_16 = arith.constant 0 : index
    %32 = vector.load %arg11[%31, %c0_16] : memref<16x32xf32, #tpu.memory_space<vmem>>, vector<2x32xf32>
    tpu.vector_store %arg11[%31, %c0_16], %30 {strides = array<i32>} : memref<16x32xf32, #tpu.memory_space<vmem>>, vector<2x32xf32>,
    %c1_i32 = arith.constant 1 : i32
    %c2_i32_17 = arith.constant 2 : i32
    %33 = arith.muli %c1_i32, %c2_i32_17 : i32
    %34 = tpu.assume_multiple %33, 2 : i32
    %35 = arith.index_cast %34 : i32 to index
    %c0_18 = arith.constant 0 : index
    %36 = vector.load %arg10[%35, %c0_18] : memref<16x128xf32, #tpu.memory_space<vmem>>, vector<2x128xf32>
    %cst_19 = arith.constant dense<0.000000e+00> : vector<2x128xf32>
    %37 = tpu.matmul %30, %7, %cst_19 {dimension_numbers = #tpu.dot_dimension_numbers<[1], [0], [0], [1], [0, 0, 1, 1], [], []>} : vector<2x32xf32>, vector<32x128xf32>, vector<2x128xf32> -> vector<2x128xf32>
    %38 = arith.addf %36, %37 : vector<2x128xf32>
    %39 = arith.negf %38 : vector<2x128xf32>
    %40 = math.exp %39 : vector<2x128xf32>
    %cst_20 = arith.constant 1.000000e+00 : f32
    %41 = vector.broadcast %cst_20 : f32 to vector<2x128xf32>
    %42 = arith.addf %41, %40 : vector<2x128xf32>
    %43 = arith.divf %41, %42 : vector<2x128xf32>
    %44 = math.tanh %38 : vector<2x128xf32>
    %45 = vector.extract_strided_slice %43 {offsets = [0, 0], sizes = [2, 32], strides = [1, 1]} : vector<2x128xf32> to vector<2x32xf32>
    %46 = vector.extract_strided_slice %43 {offsets = [0, 32], sizes = [2, 32], strides = [1, 1]} : vector<2x128xf32> to vector<2x32xf32>
    %47 = vector.extract_strided_slice %44 {offsets = [0, 64], sizes = [2, 32], strides = [1, 1]} : vector<2x128xf32> to vector<2x32xf32>
    %48 = vector.extract_strided_slice %43 {offsets = [0, 96], sizes = [2, 32], strides = [1, 1]} : vector<2x128xf32> to vector<2x32xf32>
    %49 = arith.mulf %46, %28 : vector<2x32xf32>
    %50 = arith.mulf %45, %47 : vector<2x32xf32>
    %51 = arith.addf %49, %50 : vector<2x32xf32>
    %52 = math.tanh %51 : vector<2x32xf32>
    %53 = arith.mulf %48, %52 : vector<2x32xf32>
    %54 = arith.index_cast %34 : i32 to index
    %c0_21 = arith.constant 0 : index
    %55 = vector.load %arg11[%54, %c0_21] : memref<16x32xf32, #tpu.memory_space<vmem>>, vector<2x32xf32>
    tpu.vector_store %arg11[%54, %c0_21], %53 {strides = array<i32>} : memref<16x32xf32, #tpu.memory_space<vmem>>, vector<2x32xf32>,
    %c2_i32_22 = arith.constant 2 : i32
    %c2_i32_23 = arith.constant 2 : i32
    %56 = arith.muli %c2_i32_22, %c2_i32_23 : i32
    %57 = tpu.assume_multiple %56, 2 : i32
    %58 = arith.index_cast %57 : i32 to index
    %c0_24 = arith.constant 0 : index
    %59 = vector.load %arg10[%58, %c0_24] : memref<16x128xf32, #tpu.memory_space<vmem>>, vector<2x128xf32>
    %cst_25 = arith.constant dense<0.000000e+00> : vector<2x128xf32>
    %60 = tpu.matmul %53, %7, %cst_25 {dimension_numbers = #tpu.dot_dimension_numbers<[1], [0], [0], [1], [0, 0, 1, 1], [], []>} : vector<2x32xf32>, vector<32x128xf32>, vector<2x128xf32> -> vector<2x128xf32>
    %61 = arith.addf %59, %60 : vector<2x128xf32>
    %62 = arith.negf %61 : vector<2x128xf32>
    %63 = math.exp %62 : vector<2x128xf32>
    %cst_26 = arith.constant 1.000000e+00 : f32
    %64 = vector.broadcast %cst_26 : f32 to vector<2x128xf32>
    %65 = arith.addf %64, %63 : vector<2x128xf32>
    %66 = arith.divf %64, %65 : vector<2x128xf32>
    %67 = math.tanh %61 : vector<2x128xf32>
    %68 = vector.extract_strided_slice %66 {offsets = [0, 0], sizes = [2, 32], strides = [1, 1]} : vector<2x128xf32> to vector<2x32xf32>
    %69 = vector.extract_strided_slice %66 {offsets = [0, 32], sizes = [2, 32], strides = [1, 1]} : vector<2x128xf32> to vector<2x32xf32>
    %70 = vector.extract_strided_slice %67 {offsets = [0, 64], sizes = [2, 32], strides = [1, 1]} : vector<2x128xf32> to vector<2x32xf32>
    %71 = vector.extract_strided_slice %66 {offsets = [0, 96], sizes = [2, 32], strides = [1, 1]} : vector<2x128xf32> to vector<2x32xf32>
    %72 = arith.mulf %69, %51 : vector<2x32xf32>
    %73 = arith.mulf %68, %70 : vector<2x32xf32>
    %74 = arith.addf %72, %73 : vector<2x32xf32>
    %75 = math.tanh %74 : vector<2x32xf32>
    %76 = arith.mulf %71, %75 : vector<2x32xf32>
    %77 = arith.index_cast %57 : i32 to index
    %c0_27 = arith.constant 0 : index
    %78 = vector.load %arg11[%77, %c0_27] : memref<16x32xf32, #tpu.memory_space<vmem>>, vector<2x32xf32>
    tpu.vector_store %arg11[%77, %c0_27], %76 {strides = array<i32>} : memref<16x32xf32, #tpu.memory_space<vmem>>, vector<2x32xf32>,
    %c3_i32 = arith.constant 3 : i32
    %c2_i32_28 = arith.constant 2 : i32
    %79 = arith.muli %c3_i32, %c2_i32_28 : i32
    %80 = tpu.assume_multiple %79, 2 : i32
    %81 = arith.index_cast %80 : i32 to index
    %c0_29 = arith.constant 0 : index
    %82 = vector.load %arg10[%81, %c0_29] : memref<16x128xf32, #tpu.memory_space<vmem>>, vector<2x128xf32>
    %cst_30 = arith.constant dense<0.000000e+00> : vector<2x128xf32>
    %83 = tpu.matmul %76, %7, %cst_30 {dimension_numbers = #tpu.dot_dimension_numbers<[1], [0], [0], [1], [0, 0, 1, 1], [], []>} : vector<2x32xf32>, vector<32x128xf32>, vector<2x128xf32> -> vector<2x128xf32>
    %84 = arith.addf %82, %83 : vector<2x128xf32>
    %85 = arith.negf %84 : vector<2x128xf32>
    %86 = math.exp %85 : vector<2x128xf32>
    %cst_31 = arith.constant 1.000000e+00 : f32
    %87 = vector.broadcast %cst_31 : f32 to vector<2x128xf32>
    %88 = arith.addf %87, %86 : vector<2x128xf32>
    %89 = arith.divf %87, %88 : vector<2x128xf32>
    %90 = math.tanh %84 : vector<2x128xf32>
    %91 = vector.extract_strided_slice %89 {offsets = [0, 0], sizes = [2, 32], strides = [1, 1]} : vector<2x128xf32> to vector<2x32xf32>
    %92 = vector.extract_strided_slice %89 {offsets = [0, 32], sizes = [2, 32], strides = [1, 1]} : vector<2x128xf32> to vector<2x32xf32>
    %93 = vector.extract_strided_slice %90 {offsets = [0, 64], sizes = [2, 32], strides = [1, 1]} : vector<2x128xf32> to vector<2x32xf32>
    %94 = vector.extract_strided_slice %89 {offsets = [0, 96], sizes = [2, 32], strides = [1, 1]} : vector<2x128xf32> to vector<2x32xf32>
    %95 = arith.mulf %92, %74 : vector<2x32xf32>
    %96 = arith.mulf %91, %93 : vector<2x32xf32>
    %97 = arith.addf %95, %96 : vector<2x32xf32>
    %98 = math.tanh %97 : vector<2x32xf32>
    %99 = arith.mulf %94, %98 : vector<2x32xf32>
    %100 = arith.index_cast %80 : i32 to index
    %c0_32 = arith.constant 0 : index
    %101 = vector.load %arg11[%100, %c0_32] : memref<16x32xf32, #tpu.memory_space<vmem>>, vector<2x32xf32>
    tpu.vector_store %arg11[%100, %c0_32], %99 {strides = array<i32>} : memref<16x32xf32, #tpu.memory_space<vmem>>, vector<2x32xf32>,
    %c4_i32 = arith.constant 4 : i32
    %c2_i32_33 = arith.constant 2 : i32
    %102 = arith.muli %c4_i32, %c2_i32_33 : i32
    %103 = tpu.assume_multiple %102, 2 : i32
    %104 = arith.index_cast %103 : i32 to index
    %c0_34 = arith.constant 0 : index
    %105 = vector.load %arg10[%104, %c0_34] : memref<16x128xf32, #tpu.memory_space<vmem>>, vector<2x128xf32>
    %cst_35 = arith.constant dense<0.000000e+00> : vector<2x128xf32>
    %106 = tpu.matmul %99, %7, %cst_35 {dimension_numbers = #tpu.dot_dimension_numbers<[1], [0], [0], [1], [0, 0, 1, 1], [], []>} : vector<2x32xf32>, vector<32x128xf32>, vector<2x128xf32> -> vector<2x128xf32>
    %107 = arith.addf %105, %106 : vector<2x128xf32>
    %108 = arith.negf %107 : vector<2x128xf32>
    %109 = math.exp %108 : vector<2x128xf32>
    %cst_36 = arith.constant 1.000000e+00 : f32
    %110 = vector.broadcast %cst_36 : f32 to vector<2x128xf32>
    %111 = arith.addf %110, %109 : vector<2x128xf32>
    %112 = arith.divf %110, %111 : vector<2x128xf32>
    %113 = math.tanh %107 : vector<2x128xf32>
    %114 = vector.extract_strided_slice %112 {offsets = [0, 0], sizes = [2, 32], strides = [1, 1]} : vector<2x128xf32> to vector<2x32xf32>
    %115 = vector.extract_strided_slice %112 {offsets = [0, 32], sizes = [2, 32], strides = [1, 1]} : vector<2x128xf32> to vector<2x32xf32>
    %116 = vector.extract_strided_slice %113 {offsets = [0, 64], sizes = [2, 32], strides = [1, 1]} : vector<2x128xf32> to vector<2x32xf32>
    %117 = vector.extract_strided_slice %112 {offsets = [0, 96], sizes = [2, 32], strides = [1, 1]} : vector<2x128xf32> to vector<2x32xf32>
    %118 = arith.mulf %115, %97 : vector<2x32xf32>
    %119 = arith.mulf %114, %116 : vector<2x32xf32>
    %120 = arith.addf %118, %119 : vector<2x32xf32>
    %121 = math.tanh %120 : vector<2x32xf32>
    %122 = arith.mulf %117, %121 : vector<2x32xf32>
    %123 = arith.index_cast %103 : i32 to index
    %c0_37 = arith.constant 0 : index
    %124 = vector.load %arg11[%123, %c0_37] : memref<16x32xf32, #tpu.memory_space<vmem>>, vector<2x32xf32>
    tpu.vector_store %arg11[%123, %c0_37], %122 {strides = array<i32>} : memref<16x32xf32, #tpu.memory_space<vmem>>, vector<2x32xf32>,
    %c5_i32 = arith.constant 5 : i32
    %c2_i32_38 = arith.constant 2 : i32
    %125 = arith.muli %c5_i32, %c2_i32_38 : i32
    %126 = tpu.assume_multiple %125, 2 : i32
    %127 = arith.index_cast %126 : i32 to index
    %c0_39 = arith.constant 0 : index
    %128 = vector.load %arg10[%127, %c0_39] : memref<16x128xf32, #tpu.memory_space<vmem>>, vector<2x128xf32>
    %cst_40 = arith.constant dense<0.000000e+00> : vector<2x128xf32>
    %129 = tpu.matmul %122, %7, %cst_40 {dimension_numbers = #tpu.dot_dimension_numbers<[1], [0], [0], [1], [0, 0, 1, 1], [], []>} : vector<2x32xf32>, vector<32x128xf32>, vector<2x128xf32> -> vector<2x128xf32>
    %130 = arith.addf %128, %129 : vector<2x128xf32>
    %131 = arith.negf %130 : vector<2x128xf32>
    %132 = math.exp %131 : vector<2x128xf32>
    %cst_41 = arith.constant 1.000000e+00 : f32
    %133 = vector.broadcast %cst_41 : f32 to vector<2x128xf32>
    %134 = arith.addf %133, %132 : vector<2x128xf32>
    %135 = arith.divf %133, %134 : vector<2x128xf32>
    %136 = math.tanh %130 : vector<2x128xf32>
    %137 = vector.extract_strided_slice %135 {offsets = [0, 0], sizes = [2, 32], strides = [1, 1]} : vector<2x128xf32> to vector<2x32xf32>
    %138 = vector.extract_strided_slice %135 {offsets = [0, 32], sizes = [2, 32], strides = [1, 1]} : vector<2x128xf32> to vector<2x32xf32>
    %139 = vector.extract_strided_slice %136 {offsets = [0, 64], sizes = [2, 32], strides = [1, 1]} : vector<2x128xf32> to vector<2x32xf32>
    %140 = vector.extract_strided_slice %135 {offsets = [0, 96], sizes = [2, 32], strides = [1, 1]} : vector<2x128xf32> to vector<2x32xf32>
    %141 = arith.mulf %138, %120 : vector<2x32xf32>
    %142 = arith.mulf %137, %139 : vector<2x32xf32>
    %143 = arith.addf %141, %142 : vector<2x32xf32>
    %144 = math.tanh %143 : vector<2x32xf32>
    %145 = arith.mulf %140, %144 : vector<2x32xf32>
    %146 = arith.index_cast %126 : i32 to index
    %c0_42 = arith.constant 0 : index
    %147 = vector.load %arg11[%146, %c0_42] : memref<16x32xf32, #tpu.memory_space<vmem>>, vector<2x32xf32>
    tpu.vector_store %arg11[%146, %c0_42], %145 {strides = array<i32>} : memref<16x32xf32, #tpu.memory_space<vmem>>, vector<2x32xf32>,
    %c6_i32 = arith.constant 6 : i32
    %c2_i32_43 = arith.constant 2 : i32
    %148 = arith.muli %c6_i32, %c2_i32_43 : i32
    %149 = tpu.assume_multiple %148, 2 : i32
    %150 = arith.index_cast %149 : i32 to index
    %c0_44 = arith.constant 0 : index
    %151 = vector.load %arg10[%150, %c0_44] : memref<16x128xf32, #tpu.memory_space<vmem>>, vector<2x128xf32>
    %cst_45 = arith.constant dense<0.000000e+00> : vector<2x128xf32>
    %152 = tpu.matmul %145, %7, %cst_45 {dimension_numbers = #tpu.dot_dimension_numbers<[1], [0], [0], [1], [0, 0, 1, 1], [], []>} : vector<2x32xf32>, vector<32x128xf32>, vector<2x128xf32> -> vector<2x128xf32>
    %153 = arith.addf %151, %152 : vector<2x128xf32>
    %154 = arith.negf %153 : vector<2x128xf32>
    %155 = math.exp %154 : vector<2x128xf32>
    %cst_46 = arith.constant 1.000000e+00 : f32
    %156 = vector.broadcast %cst_46 : f32 to vector<2x128xf32>
    %157 = arith.addf %156, %155 : vector<2x128xf32>
    %158 = arith.divf %156, %157 : vector<2x128xf32>
    %159 = math.tanh %153 : vector<2x128xf32>
    %160 = vector.extract_strided_slice %158 {offsets = [0, 0], sizes = [2, 32], strides = [1, 1]} : vector<2x128xf32> to vector<2x32xf32>
    %161 = vector.extract_strided_slice %158 {offsets = [0, 32], sizes = [2, 32], strides = [1, 1]} : vector<2x128xf32> to vector<2x32xf32>
    %162 = vector.extract_strided_slice %159 {offsets = [0, 64], sizes = [2, 32], strides = [1, 1]} : vector<2x128xf32> to vector<2x32xf32>
    %163 = vector.extract_strided_slice %158 {offsets = [0, 96], sizes = [2, 32], strides = [1, 1]} : vector<2x128xf32> to vector<2x32xf32>
    %164 = arith.mulf %161, %143 : vector<2x32xf32>
    %165 = arith.mulf %160, %162 : vector<2x32xf32>
    %166 = arith.addf %164, %165 : vector<2x32xf32>
    %167 = math.tanh %166 : vector<2x32xf32>
    %168 = arith.mulf %163, %167 : vector<2x32xf32>
    %169 = arith.index_cast %149 : i32 to index
    %c0_47 = arith.constant 0 : index
    %170 = vector.load %arg11[%169, %c0_47] : memref<16x32xf32, #tpu.memory_space<vmem>>, vector<2x32xf32>
    tpu.vector_store %arg11[%169, %c0_47], %168 {strides = array<i32>} : memref<16x32xf32, #tpu.memory_space<vmem>>, vector<2x32xf32>,
    %c7_i32 = arith.constant 7 : i32
    %c2_i32_48 = arith.constant 2 : i32
    %171 = arith.muli %c7_i32, %c2_i32_48 : i32
    %172 = tpu.assume_multiple %171, 2 : i32
    %173 = arith.index_cast %172 : i32 to index
    %c0_49 = arith.constant 0 : index
    %174 = vector.load %arg10[%173, %c0_49] : memref<16x128xf32, #tpu.memory_space<vmem>>, vector<2x128xf32>
    %cst_50 = arith.constant dense<0.000000e+00> : vector<2x128xf32>
    %175 = tpu.matmul %168, %7, %cst_50 {dimension_numbers = #tpu.dot_dimension_numbers<[1], [0], [0], [1], [0, 0, 1, 1], [], []>} : vector<2x32xf32>, vector<32x128xf32>, vector<2x128xf32> -> vector<2x128xf32>
    %176 = arith.addf %174, %175 : vector<2x128xf32>
    %177 = arith.negf %176 : vector<2x128xf32>
    %178 = math.exp %177 : vector<2x128xf32>
    %cst_51 = arith.constant 1.000000e+00 : f32
    %179 = vector.broadcast %cst_51 : f32 to vector<2x128xf32>
    %180 = arith.addf %179, %178 : vector<2x128xf32>
    %181 = arith.divf %179, %180 : vector<2x128xf32>
    %182 = math.tanh %176 : vector<2x128xf32>
    %183 = vector.extract_strided_slice %181 {offsets = [0, 0], sizes = [2, 32], strides = [1, 1]} : vector<2x128xf32> to vector<2x32xf32>
    %184 = vector.extract_strided_slice %181 {offsets = [0, 32], sizes = [2, 32], strides = [1, 1]} : vector<2x128xf32> to vector<2x32xf32>
    %185 = vector.extract_strided_slice %182 {offsets = [0, 64], sizes = [2, 32], strides = [1, 1]} : vector<2x128xf32> to vector<2x32xf32>
    %186 = vector.extract_strided_slice %181 {offsets = [0, 96], sizes = [2, 32], strides = [1, 1]} : vector<2x128xf32> to vector<2x32xf32>
    %187 = arith.mulf %184, %166 : vector<2x32xf32>
    %188 = arith.mulf %183, %185 : vector<2x32xf32>
    %189 = arith.addf %187, %188 : vector<2x32xf32>
    %190 = math.tanh %189 : vector<2x32xf32>
    %191 = arith.mulf %186, %190 : vector<2x32xf32>
    %192 = arith.index_cast %172 : i32 to index
    %c0_52 = arith.constant 0 : index
    %193 = vector.load %arg11[%192, %c0_52] : memref<16x32xf32, #tpu.memory_space<vmem>>, vector<2x32xf32>
    tpu.vector_store %arg11[%192, %c0_52], %191 {strides = array<i32>} : memref<16x32xf32, #tpu.memory_space<vmem>>, vector<2x32xf32>,
    %c8_i32 = arith.constant 8 : i32
    %c0_53 = arith.constant 0 : index
    %c0_54 = arith.constant 0 : index
    %194 = vector.load %arg11[%c0_53, %c0_54] : memref<16x32xf32, #tpu.memory_space<vmem>>, vector<16x32xf32>
    %195 = math.tanh %194 : vector<16x32xf32>
    %c0_55 = arith.constant 0 : index
    %c0_56 = arith.constant 0 : index
    %196 = vector.load %arg7[%c0_55, %c0_56] : memref<32x128xf32, #tpu.memory_space<vmem>>, vector<32x128xf32>
    %cst_57 = arith.constant dense<0.000000e+00> : vector<16x128xf32>
    %197 = tpu.matmul %195, %196, %cst_57 {dimension_numbers = #tpu.dot_dimension_numbers<[1], [0], [0], [1], [0, 0, 1, 1], [], []>} : vector<16x32xf32>, vector<32x128xf32>, vector<16x128xf32> -> vector<16x128xf32>
    %c0_58 = arith.constant 0 : index
    %c0_59 = arith.constant 0 : index
    %198 = vector.load %arg8[%c0_58, %c0_59] : memref<1x128xf32, #tpu.memory_space<vmem>>, vector<1x128xf32>
    %199 = vector.broadcast %198 : vector<1x128xf32> to vector<16x128xf32>
    %200 = arith.addf %197, %199 : vector<16x128xf32>
    %c0_60 = arith.constant 0 : index
    %c0_61 = arith.constant 0 : index
    %201 = vector.load %arg9[%c0_60, %c0_61] : memref<16x128xf32, #tpu.memory_space<vmem>>, vector<16x128xf32>
    tpu.vector_store %arg9[%c0_60, %c0_61], %200 {strides = array<i32>} : memref<16x128xf32, #tpu.memory_space<vmem>>, vector<16x128xf32>,
    return
  }
  func.func @transform_0(%arg0: i32) -> (i32, i32) {
    %c0_i32 = arith.constant 0 : i32
    %c0_i32_0 = arith.constant 0 : i32
    %c0_i32_1 = arith.constant 0 : i32
    return %c0_i32, %c0_i32_0 : i32, i32
  }
  func.func @transform_1(%arg0: i32) -> (i32, i32) {
    %c0_i32 = arith.constant 0 : i32
    %c0_i32_0 = arith.constant 0 : i32
    %c0_i32_1 = arith.constant 0 : i32
    return %c0_i32, %c0_i32_0 : i32, i32
  }
  func.func @transform_2(%arg0: i32) -> (i32, i32) {
    %c0_i32 = arith.constant 0 : i32
    %c0_i32_0 = arith.constant 0 : i32
    %c0_i32_1 = arith.constant 0 : i32
    return %c0_i32, %c0_i32_0 : i32, i32
  }
  func.func @transform_3(%arg0: i32) -> (i32, i32) {
    %c0_i32 = arith.constant 0 : i32
    %c0_i32_0 = arith.constant 0 : i32
    %c0_i32_1 = arith.constant 0 : i32
    return %c0_i32, %c0_i32_0 : i32, i32
  }
  func.func @transform_4(%arg0: i32) -> (i32, i32) {
    %c0_i32 = arith.constant 0 : i32
    %c0_i32_0 = arith.constant 0 : i32
    %c0_i32_1 = arith.constant 0 : i32
    return %c0_i32, %c0_i32_0 : i32, i32
  }
  func.func @transform_5(%arg0: i32) -> (i32, i32) {
    %c0_i32 = arith.constant 0 : i32
    %c0_i32_0 = arith.constant 0 : i32
    %c0_i32_1 = arith.constant 0 : i32
    return %c0_i32, %c0_i32_0 : i32, i32
  }
  func.func @transform_6(%arg0: i32) -> (i32, i32) {
    %c0_i32 = arith.constant 0 : i32
    %c0_i32_0 = arith.constant 0 : i32
    %c0_i32_1 = arith.constant 0 : i32
    return %c0_i32, %c0_i32_0 : i32, i32
  }
  func.func @transform_7(%arg0: i32) -> (i32, i32) {
    %c0_i32 = arith.constant 0 : i32
    %c0_i32_0 = arith.constant 0 : i32
    %c0_i32_1 = arith.constant 0 : i32
    return %c0_i32, %c0_i32_0 : i32, i32
  }
  func.func @transform_8(%arg0: i32) -> (i32, i32) {
    %c0_i32 = arith.constant 0 : i32
    %c0_i32_0 = arith.constant 0 : i32
    %c0_i32_1 = arith.constant 0 : i32
    return %c0_i32, %c0_i32_0 : i32, i32
  }
}

</mosaic_0001>

<bundles_post_ra>
// kernel: predictor_forward.1
= control target key start
LH: loop header
LB: loop body
LE: loop exit
PB: predicated region body
PF: predicated region fallthrough
CT: control target
= control target key end

     0   :  { %13 = vsyncpa [#allocation5], 0  ;;  %s1796_s0 = inlined_call_operand.hbm [shape: f32[16,16], index: 0, kind: input, shape index: {}]   ;;  %s1797_s1 = inlined_call_operand.vmem [shape: f32[2,32], index: 1, kind: input, shape index: {}]   ;;  %s1798_s2 = inlined_call_operand.vmem [shape: f32[2,32], index: 2, kind: input, shape index: {}]   ;;  %s1799_s3 = inlined_call_operand.hbm [shape: f32[16,128], index: 3, kind: input, shape index: {}]   ;;  %s1800_s4 = inlined_call_operand.hbm [shape: f32[32,128], index: 4, kind: input, shape index: {}]   ;;  %s1801_s5 = inlined_call_operand.vmem [shape: f32[1,128], index: 5, kind: input, shape index: {}]   ;;  %s1802_s6 = inlined_call_operand.vmem [shape: f32[32,128], index: 6, kind: input, shape index: {}]   ;;  %s1803_s7 = inlined_call_operand.hbm [shape: f32[1,128], index: 7, kind: input, shape index: {}]   ;;  %s1804_s8 = inlined_call_operand.vmem [shape: f32[16,128], index: 8, kind: output, shape index: {}]  }
   0x1   :  { %14 = vsyncpa [#allocation7], 0 }
   0x2   :  { %15 = vsyncpa [#allocation10], 0  ;;  %s1544_s27 = smov [#allocation6]   ;;  %s1545_s29 = smov [#allocation4]  }
   0x3   :  { %s37_s28 = sshll.u32 %s1544_s27, 4  ;;  %s21_s30 = sshll.u32 %s1545_s29, 4  ;;  %s38_s28 = int_to_ptr.vmem [resolvable:$true] %s37_s28  ;;  %s1600_s30 = int_to_ptr.vmem [resolvable:$true] %s21_s30 }
   0x4   :  { %s1450_s11 = scalar_lea.hbm %s1799_s3, 256 }
   0x5   :  { %p1451_p0 = scmp.ne.s32.totalorder %s1799_s3, %s1450_s11  ;;  %p1454_p1 = scmp.lt.u32.totalorder %s1450_s11, %s1799_s3 }
   0x7   :  { %p1456_p2 = pnand %p1454_p1, %p1451_p0 }
   0x9   :  { %1459 = shalt.err (!%p1456_p2)
}
   0xa   :  { %s1460_s16 = scalar_lea.vmem %s38_s28, 256  ;;  %p1465_p4 = scmp.lt.s32.totalorder %s38_s28, %s38_s28 }
   0xb   :  { %p1461_p3 = scmp.ne.s32.totalorder %s38_s28, %s1460_s16  ;;  %p1466_p5 = scmp.lt.s32.totalorder %s1460_s16, %s1460_s16 }
   0xd   :  { %p1467_p6 = por %p1466_p5, %p1465_p4 }
   0xf   :  { %p1468_p7 = pnand %p1467_p6, %p1461_p3 }
  0x11   :  { %1471 = shalt.err (!%p1468_p7)
}
  0x12   :  { %s1546_s17 = smov 128   ;;  %s1547_s18 = smov 8  }
  0x13   :  { %43 = dma.hbm_to_vmem [thread:$0]  %s1799_s3, 256, %s38_s28, [#allocation7], %s1546_s17, %s1546_s17, %s1547_s18  }
  0x14   :  { %s1472_s23 = scalar_lea.hbm %s1796_s0, 256 }
  0x15   :  { %p1473_p8 = scmp.ne.s32.totalorder %s1796_s0, %s1472_s23  ;;  %p1476_p9 = scmp.lt.u32.totalorder %s1472_s23, %s1796_s0 }
  0x17   :  { %p1478_p10 = pnand %p1476_p9, %p1473_p8 }
  0x19   :  { %1481 = shalt.err (!%p1478_p10)
}
  0x1a   :  { %s1482_s29 = scalar_lea.vmem %s1600_s30, 256  ;;  %p1487_p12 = scmp.lt.s32.totalorder %s1600_s30, %s1600_s30 }
  0x1b   :  { %p1483_p11 = scmp.ne.s32.totalorder %s1600_s30, %s1482_s29  ;;  %p1488_p13 = scmp.lt.s32.totalorder %s1482_s29, %s1482_s29 }
  0x1d   :  { %p1489_p0 = por %p1488_p13, %p1487_p12 }
  0x1f   :  { %p1490_p1 = pnand %p1489_p0, %p1483_p11 }
  0x21   :  { %1493 = shalt.err (!%p1490_p1)
}
  0x22   :  { %27 = dma.hbm_to_vmem [thread:$0]  %s1796_s0, 256, %s1600_s30, [#allocation5], %s1546_s17, %s1546_s17, %s1547_s18  }
  0x23   :  { %s1548_s9 = smov [#allocation8]   ;;  %s1549_s11 = smov [#allocation9]  }
  0x24   :  { %s49_s10 = sshll.u32 %s1548_s9, 4  ;;  %s66_s12 = sshll.u32 %s1549_s11, 4  ;;  %s50_s10 = int_to_ptr.vmem [resolvable:$true] %s49_s10  ;;  %s67_s12 = int_to_ptr.vmem [resolvable:$true] %s66_s12 }
  0x25   :  { %s1494_s15 = scalar_lea.hbm %s1800_s4, 512 }
  0x26   :  { %p1495_p2 = scmp.ne.s32.totalorder %s1800_s4, %s1494_s15  ;;  %p1498_p3 = scmp.lt.u32.totalorder %s1494_s15, %s1800_s4 }
  0x28   :  { %p1500_p4 = pnand %p1498_p3, %p1495_p2 }
  0x2a   :  { %1503 = shalt.err (!%p1500_p4)
}
  0x2b   :  { %s1504_s0 = scalar_lea.vmem %s50_s10, 512  ;;  %p1509_p6 = scmp.lt.s32.totalorder %s50_s10, %s50_s10 }
  0x2c   :  { %p1505_p5 = scmp.ne.s32.totalorder %s50_s10, %s1504_s0  ;;  %p1510_p7 = scmp.lt.s32.totalorder %s1504_s0, %s1504_s0 }
  0x2e   :  { %p1511_p8 = por %p1510_p7, %p1509_p6 }
  0x30   :  { %p1512_p9 = pnand %p1511_p8, %p1505_p5 }
  0x32   :  { %1515 = shalt.err (!%p1512_p9)
}
  0x33   :  { %55 = dma.hbm_to_vmem [thread:$0]  %s1800_s4, 512, %s50_s10, [#allocation7], %s1546_s17, %s1546_s17, %s1547_s18  }
  0x34   :  { %s1516_s25 = scalar_lea.hbm %s1803_s7, 16 }
  0x35   :  { %p1517_p10 = scmp.ne.s32.totalorder %s1803_s7, %s1516_s25  ;;  %p1520_p11 = scmp.lt.u32.totalorder %s1516_s25, %s1803_s7 }
  0x37   :  { %p1522_p12 = pnand %p1520_p11, %p1517_p10 }
  0x39   :  { %1525 = shalt.err (!%p1522_p12)
}
  0x3a   :  { %s1526_s28 = scalar_lea.vmem %s67_s12, 16  ;;  %s1530_s9 = scalar_lea.vmem %s67_s12, 32 }
  0x3b   :  { %p1527_p13 = scmp.ne.s32.totalorder %s67_s12, %s1526_s28  ;;  %p1531_p0 = scmp.lt.s32.totalorder %s67_s12, %s67_s12 }
  0x3c   :  { %p1532_p1 = scmp.lt.s32.totalorder %s1530_s9, %s1526_s28 }
  0x3e   :  { %p1533_p2 = por %p1532_p1, %p1531_p0 }
  0x40   :  { %p1534_p3 = pnand %p1533_p2, %p1527_p13 }
  0x42   :  { %1537 = shalt.err (!%p1534_p3)
}
  0x43   :  { %69 = dma.hbm_to_vmem [thread:$0]  %s1803_s7, 16, %s67_s12, [#allocation10]  }
  0x44   :  { %1538 = dma.done.wait [#allocation5], 256  }
  0x45   :  { %1539 = vsyncadd [#allocation5], 4294967040 }
  0x46   :  { %1540 = dma.done.wait [#allocation7], 768  }
  0x47   :  { %1541 = vsyncadd [#allocation7], 4294966528 }
  0x48   :  { %1542 = dma.done.wait [#allocation10], 16  }
  0x49   :  { %1543 = vsyncadd [#allocation10], 4294967280  ;;  %v1550_v0 = vmov 0.0|0.0   ;;  %vm1551_vm0 = vmmov 0   ;;  %v1552_v1 = vmov 0.0   ;;  %vm93_vm1 = vcmask 130048  }
  0x4a   :  { %1315 = vmatprep.subr.bf16.mxu1 %v1550_v0  ;;  %1220 = vmatprep.mubr.msk.f32.mxu1 %vm1551_vm0, %v1552_v1  ;;  %v84_v2 = vld [vmem:[#allocation6] sm:$0xff]  ;;  %v85_v3 = vld [vmem:[#allocation6 + $0x8] sm:$0xff]  ;;  %v82_v4 = vld [vmem:[#allocation4] sm:$0xff]  ;;  %vm184_vm2 = vcmask 261120   ;;  %s1553_s11 = smov 64   ;;  %vm291_vm3 = vcmask 254976  }
  0x4b   :  { %v1311_v5 = vpack.c.bf16 %v85_v3, %v84_v2  ;;  %1209 = vmatprep.mubr.msk.f32.mxu0 %vm93_vm1, %v82_v4  ;;  %v177_v6 = vld [vmem:[#allocation8] sm:$0xff]  ;;  %v178_v7 = vld [vmem:[#allocation8 + $0x8] sm:$0xff]  ;;  %v179_v9 = vld [vmem:[#allocation8 + $0x10] sm:$0xff] }
  0x4c   :  { %v1668_v8 = vpack.c.bf16 %v178_v7, %v177_v6  ;;  %v180_v10 = vld [vmem:[#allocation8 + $0x18] sm:$0xff]  ;;  %v83_v11 = vld [vmem:[#allocation4 + $0x8] sm:$0xff]  ;;  %v181_v13 = vld [vmem:[%s1797_s1] sm:$0x3] }
  0x4d   :  { %1312 = vmatprep.subr.bf16.mxu0 %v1311_v5  ;;  %v1671_v12 = vpack.c.bf16 %v180_v10, %v179_v9  ;;  %v1133_v14 = vld [vmem:[%s1801_s5] ss:$0 sm:$0xff]  ;;  %s1554_s5 = smov 32  }
  0x4e   :  { %1314 = vmatpush3.bf16.msra.mxu0 %v1311_v5  ;;  %1317 = vmatpush3.bf16.msra.mxu1 %v1668_v8  ;;  %v182_v24 = vld [vmem:[%s1798_s2] sm:$0x3] }
  0x4f   :  { %1318 = vmatprep.subr.bf16.mxu1 %v1550_v0  ;;  %1321 = vmatprep.subr.bf16.mxu0 %v1550_v0 }
  0x51   :  { %1210 = vmatmul.mubr.msk.f32.vlgmr.msra.gmra.mrb[0].mxu0 %vm93_vm1, %v83_v11 }
  0x52   :  { %1320 = vmatpush3.bf16.msra.mxu1 %v1671_v12  ;;  %1323 = vmatpush3.bf16.msra.mxu0 %v1668_v8 }
  0x53   :  { %1324 = vmatprep.subr.bf16.mxu0 %v1550_v0  ;;  %1231 = vmatprep.mubr.msk.f32.mxu0 %vm1551_vm0, %v1552_v1 }
  0x54   :  { %1327 = vmatprep.subr.bf16.mxu1 %v1550_v0 }
  0x55   :  { %1221 = vmatmul.mubr.msk.f32.vlgmr.msra.gmra.mrb[0].mxu1 %vm184_vm2, %v181_v13 }
  0x56   :  { %1326 = vmatpush3.bf16.msra.mxu0 %v1671_v12  ;;  %1329 = vmatpush3.bf16.msra.mxu1 %v1668_v8 }
  0x57   :  { %1330 = vmatprep.subr.bf16.mxu1 %v1550_v0  ;;  %1242 = vmatprep.mubr.msk.f32.mxu1 %vm1551_vm0, %v1552_v1 }
  0x58   :  { %1333 = vmatprep.subr.bf16.mxu0 %v1550_v0 }
  0x5a   :  { %1332 = vmatpush3.bf16.msra.mxu1 %v1671_v12 }
  0x5b   :  { %1339 = vmatprep.subr.bf16.mxu1 %v1550_v0 }
 0x124   :  { %v1211_v15 = vpop.f32.mrb[0].mxu0 }
 0x125   :  { %v172_v16 = vadd.f32 %v1211_v15, %v1133_v14  ;;  %v166_v17 = vpop.f32.mrb[1].mxu0 }
 0x126   :  { %v167_v18 = vadd.f32 %v1133_v14, %v166_v17 }
 0x127   :  { %176 = vst [vmem:[#allocation2 + $0x8] sm:$0xff] %v172_v16 }
 0x128   :  { %175 = vst [vmem:[#allocation2] sm:$0xff] %v167_v18  ;;  %v254_v19 = vpop.f32.mrb[0].mxu1 }
 0x129   :  { %v1222_v20 = vpop.f32.mrb[1].mxu1 }
 0x12f   :  { %v183_v21 = vld [vmem:[#allocation2] sm:$0x3]  ;;  %v294_v39 = vld [vmem:[#allocation2 + $0x2] sm:$0x3]  ;;  %v399_v57 = vld [vmem:[#allocation2 + $0x4] sm:$0x3] }
 0x130   :  { %v258_v22 = vadd.f32 %v254_v19, %v183_v21  ;;  %v504_v15 = vld [vmem:[#allocation2 + $0x6] sm:$0x3] }
 0x132   :  { %1382 = vtanh.f32 %v258_v22  ;;  %v1137_v25 = vmul.f32 -1.442695, %v258_v22 }
 0x134   :  { %1384 = vpow2.f32 %v1137_v25 }
 0x13c   :  { %v1383_v23 = vpop.eup %1382 }
 0x13d   :  { %272 = vrot.lane.b32.xlu0 %v1383_v23, %s1553_s11 }
 0x13e   :  { %v1385_v26 = vpop.eup %1384 }
 0x13f   :  { %v262_v27 = vadd.f32 1.0, %v1385_v26 }
 0x141   :  { %267 = vrot.lane.b32.xlu0 %v182_v24, %s1554_s5  ;;  %1386 = vrcp.f32 %v262_v27 }
 0x14b   :  { %v1387_v28 = vpop.eup %1386 }
 0x1af   :  { %v273_v29 = vpop.permute.xlu0 %272 }
 0x1b0   :  { %v275_v30 = vmul.f32 %v1387_v28, %v273_v29 }
 0x1b2   :  { %277 = vrot.lane.b32.xlu1 %v275_v30, %s1554_s5 }
 0x1b3   :  { %v268_v31 = vpop.permute.xlu0 %267 }
 0x1b4   :  { %v270_v32 = vmul.f32 %v1387_v28, %v268_v31 }
 0x224   :  { %v278_v33 = vpop.permute.xlu1 %277 }
 0x225   :  { %v280_v34 = vadd.f32 %v278_v33, %v270_v32  ;;  %v609_v33 = vld [vmem:[#allocation2 + $0x8] sm:$0x3] }
 0x227   :  { %1388 = vtanh.f32 %v280_v34 }
 0x231   :  { %v1389_v35 = vpop.eup %1388 }
 0x232   :  { %283 = vrot.lane.b32.xlu1 %v1389_v35, %s1553_s11 }
 0x2a4   :  { %v284_v36 = vpop.permute.xlu1 %283 }
 0x2a5   :  { %v286_v37 = vmul.f32 %v1387_v28, %v284_v36 }
 0x2a7   :  { %288 = vrot.lane.b32.xlu0 %v286_v37, %s1554_s5 }
 0x319   :  { %v289_v38 = vpop.permute.xlu0 %288 }
 0x31a   :  { %292 = vst.msk [vmem:[#allocation3] sm:$0x3] %vm291_vm3, %v289_v38  ;;  %1232 = vmatmul.mubr.msk.f32.vlgmr.msra.gmra.mrb[2].mxu0 %vm184_vm2, %v289_v38 }
 0x31b   :  { %1335 = vmatpush3.bf16.msra.mxu0 %v1668_v8  ;;  %1253 = vmatprep.mubr.msk.f32.mxu0 %vm1551_vm0, %v1552_v1 }
 0x31c   :  { %1336 = vmatprep.subr.bf16.mxu0 %v1550_v0 }
 0x31f   :  { %1338 = vmatpush3.bf16.msra.mxu0 %v1671_v12 }
 0x320   :  { %1345 = vmatprep.subr.bf16.mxu0 %v1550_v0 }
 0x3ed   :  { %v363_v40 = vpop.f32.mrb[2].mxu0 }
 0x3ee   :  { %v367_v41 = vadd.f32 %v363_v40, %v294_v39  ;;  %v1233_v42 = vpop.f32.mrb[3].mxu0 }
 0x3f0   :  { %1390 = vtanh.f32 %v367_v41  ;;  %v1139_v44 = vmul.f32 -1.442695, %v367_v41 }
 0x3f2   :  { %1392 = vpow2.f32 %v1139_v44 }
 0x3fa   :  { %v1391_v43 = vpop.eup %1390 }
 0x3fb   :  { %377 = vrot.lane.b32.xlu1 %v1391_v43, %s1553_s11 }
 0x3fc   :  { %v1393_v45 = vpop.eup %1392 }
 0x3fd   :  { %v371_v46 = vadd.f32 1.0, %v1393_v45 }
 0x3ff   :  { %1394 = vrcp.f32 %v371_v46 }
 0x409   :  { %v1395_v47 = vpop.eup %1394 }
 0x40a   :  { %v375_v50 = vmul.f32 %v1395_v47, %v280_v34 }
 0x46d   :  { %v378_v48 = vpop.permute.xlu1 %377 }
 0x46e   :  { %v380_v49 = vmul.f32 %v1395_v47, %v378_v48 }
 0x470   :  { %382 = vrot.lane.b32.xlu0 %v380_v49, %s1554_s5 }
 0x4e2   :  { %v383_v51 = vpop.permute.xlu0 %382 }
 0x4e3   :  { %v385_v52 = vadd.f32 %v383_v51, %v375_v50  ;;  %v714_v51 = vld [vmem:[#allocation2 + $0xa] sm:$0x3] }
 0x4e5   :  { %1396 = vtanh.f32 %v385_v52 }
 0x4ef   :  { %v1397_v53 = vpop.eup %1396 }
 0x4f0   :  { %388 = vrot.lane.b32.xlu1 %v1397_v53, %s1553_s11 }
 0x562   :  { %v389_v54 = vpop.permute.xlu1 %388 }
 0x563   :  { %v391_v55 = vmul.f32 %v1395_v47, %v389_v54 }
 0x565   :  { %393 = vrot.lane.b32.xlu0 %v391_v55, %s1554_s5 }
 0x5d7   :  { %v394_v56 = vpop.permute.xlu0 %393 }
 0x5d8   :  { %397 = vst.msk [vmem:[#allocation3 + $0x2] sm:$0x3] %vm291_vm3, %v394_v56  ;;  %1243 = vmatmul.mubr.msk.f32.vlgmr.msra.gmra.mrb[2].mxu1 %vm184_vm2, %v394_v56 }
 0x5d9   :  { %1341 = vmatpush3.bf16.msra.mxu1 %v1668_v8  ;;  %1264 = vmatprep.mubr.msk.f32.mxu1 %vm1551_vm0, %v1552_v1 }
 0x5da   :  { %1342 = vmatprep.subr.bf16.mxu1 %v1550_v0 }
 0x5dd   :  { %1344 = vmatpush3.bf16.msra.mxu1 %v1671_v12 }
 0x5de   :  { %1351 = vmatprep.subr.bf16.mxu1 %v1550_v0 }
 0x6ab   :  { %v468_v58 = vpop.f32.mrb[2].mxu1 }
 0x6ac   :  { %v472_v59 = vadd.f32 %v468_v58, %v399_v57  ;;  %v1244_v60 = vpop.f32.mrb[3].mxu1 }
 0x6ae   :  { %1398 = vtanh.f32 %v472_v59  ;;  %v1141_v62 = vmul.f32 -1.442695, %v472_v59 }
 0x6b0   :  { %1400 = vpow2.f32 %v1141_v62 }
 0x6b8   :  { %v1399_v61 = vpop.eup %1398 }
 0x6b9   :  { %482 = vrot.lane.b32.xlu1 %v1399_v61, %s1553_s11 }
 0x6ba   :  { %v1401_v63 = vpop.eup %1400 }
 0x6bb   :  { %v476_v2 = vadd.f32 1.0, %v1401_v63 }
 0x6bd   :  { %1402 = vrcp.f32 %v476_v2 }
 0x6c7   :  { %v1403_v3 = vpop.eup %1402 }
 0x6c8   :  { %v480_v6 = vmul.f32 %v1403_v3, %v385_v52 }
 0x72b   :  { %v483_v4 = vpop.permute.xlu1 %482 }
 0x72c   :  { %v485_v5 = vmul.f32 %v1403_v3, %v483_v4 }
 0x72e   :  { %487 = vrot.lane.b32.xlu0 %v485_v5, %s1554_s5  ;;  %v819_v5 = vld [vmem:[#allocation2 + $0xc] sm:$0x3] }
 0x7a0   :  { %v488_v7 = vpop.permute.xlu0 %487 }
 0x7a1   :  { %v490_v9 = vadd.f32 %v488_v7, %v480_v6 }
 0x7a3   :  { %1404 = vtanh.f32 %v490_v9 }
 0x7ad   :  { %v1405_v10 = vpop.eup %1404 }
 0x7ae   :  { %493 = vrot.lane.b32.xlu1 %v1405_v10, %s1553_s11 }
 0x820   :  { %v494_v11 = vpop.permute.xlu1 %493 }
 0x821   :  { %v496_v13 = vmul.f32 %v1403_v3, %v494_v11 }
 0x823   :  { %498 = vrot.lane.b32.xlu0 %v496_v13, %s1554_s5 }
 0x895   :  { %v499_v14 = vpop.permute.xlu0 %498 }
 0x896   :  { %502 = vst.msk [vmem:[#allocation3 + $0x4] sm:$0x3] %vm291_vm3, %v499_v14  ;;  %1254 = vmatmul.mubr.msk.f32.vlgmr.msra.gmra.mrb[4].mxu0 %vm184_vm2, %v499_v14 }
 0x897   :  { %1347 = vmatpush3.bf16.msra.mxu0 %v1668_v8  ;;  %1275 = vmatprep.mubr.msk.f32.mxu0 %vm1551_vm0, %v1552_v1 }
 0x898   :  { %1348 = vmatprep.subr.bf16.mxu0 %v1550_v0 }
 0x89b   :  { %1350 = vmatpush3.bf16.msra.mxu0 %v1671_v12 }
 0x89c   :  { %1357 = vmatprep.subr.bf16.mxu0 %v1550_v0 }
 0x969   :  { %v573_v16 = vpop.f32.mrb[4].mxu0 }
 0x96a   :  { %v577_v17 = vadd.f32 %v573_v16, %v504_v15  ;;  %v1255_v18 = vpop.f32.mrb[5].mxu0 }
 0x96c   :  { %1406 = vtanh.f32 %v577_v17  ;;  %v1143_v20 = vmul.f32 -1.442695, %v577_v17 }
 0x96e   :  { %1408 = vpow2.f32 %v1143_v20 }
 0x976   :  { %v1407_v19 = vpop.eup %1406 }
 0x977   :  { %587 = vrot.lane.b32.xlu1 %v1407_v19, %s1553_s11 }
 0x978   :  { %v1409_v21 = vpop.eup %1408 }
 0x979   :  { %v581_v22 = vadd.f32 1.0, %v1409_v21 }
 0x97b   :  { %1410 = vrcp.f32 %v581_v22 }
 0x985   :  { %v1411_v23 = vpop.eup %1410 }
 0x986   :  { %v585_v26 = vmul.f32 %v1411_v23, %v490_v9 }
 0x9e9   :  { %v588_v24 = vpop.permute.xlu1 %587 }
 0x9ea   :  { %v590_v25 = vmul.f32 %v1411_v23, %v588_v24 }
 0x9ec   :  { %592 = vrot.lane.b32.xlu0 %v590_v25, %s1554_s5  ;;  %v924_v25 = vld [vmem:[#allocation2 + $0xe] sm:$0x3] }
 0xa5e   :  { %v593_v27 = vpop.permute.xlu0 %592 }
 0xa5f   :  { %v595_v28 = vadd.f32 %v593_v27, %v585_v26 }
 0xa61   :  { %1412 = vtanh.f32 %v595_v28 }
 0xa6b   :  { %v1413_v29 = vpop.eup %1412 }
 0xa6c   :  { %598 = vrot.lane.b32.xlu1 %v1413_v29, %s1553_s11 }
 0xade   :  { %v599_v30 = vpop.permute.xlu1 %598 }
 0xadf   :  { %v601_v31 = vmul.f32 %v1411_v23, %v599_v30 }
 0xae1   :  { %603 = vrot.lane.b32.xlu0 %v601_v31, %s1554_s5 }
 0xb53   :  { %v604_v32 = vpop.permute.xlu0 %603 }
 0xb54   :  { %607 = vst.msk [vmem:[#allocation3 + $0x6] sm:$0x3] %vm291_vm3, %v604_v32  ;;  %1265 = vmatmul.mubr.msk.f32.vlgmr.msra.gmra.mrb[4].mxu1 %vm184_vm2, %v604_v32 }
 0xb55   :  { %1353 = vmatpush3.bf16.msra.mxu1 %v1668_v8  ;;  %1286 = vmatprep.mubr.msk.f32.mxu1 %vm1551_vm0, %v1552_v1 }
 0xb56   :  { %1354 = vmatprep.subr.bf16.mxu1 %v1550_v0 }
 0xb59   :  { %1356 = vmatpush3.bf16.msra.mxu1 %v1671_v12 }
 0xb5b   :  { %v1028_v2 = vld [vmem:[#allocation3] sm:$0xff] }
 0xc27   :  { %v678_v34 = vpop.f32.mrb[4].mxu1 }
 0xc28   :  { %v682_v35 = vadd.f32 %v678_v34, %v609_v33  ;;  %v1266_v36 = vpop.f32.mrb[5].mxu1 }
 0xc2a   :  { %1414 = vtanh.f32 %v682_v35  ;;  %v1145_v38 = vmul.f32 -1.442695, %v682_v35 }
 0xc2c   :  { %1416 = vpow2.f32 %v1145_v38 }
 0xc34   :  { %v1415_v37 = vpop.eup %1414 }
 0xc35   :  { %692 = vrot.lane.b32.xlu1 %v1415_v37, %s1553_s11 }
 0xc36   :  { %v1417_v39 = vpop.eup %1416 }
 0xc37   :  { %v686_v40 = vadd.f32 1.0, %v1417_v39 }
 0xc39   :  { %1418 = vrcp.f32 %v686_v40  ;;  %v1032_v40 = vld [vmem:[%s1802_s6] sm:$0xff] }
 0xc43   :  { %v1419_v41 = vpop.eup %1418 }
 0xc44   :  { %v690_v44 = vmul.f32 %v1419_v41, %v595_v28 }
 0xca7   :  { %v693_v42 = vpop.permute.xlu1 %692 }
 0xca8   :  { %v695_v43 = vmul.f32 %v1419_v41, %v693_v42  ;;  %v1034_v42 = vld [vmem:[%s1802_s6 + $0x10] sm:$0xff] }
 0xcaa   :  { %697 = vrot.lane.b32.xlu0 %v695_v43, %s1554_s5 }
 0xd1c   :  { %v698_v45 = vpop.permute.xlu0 %697 }
 0xd1d   :  { %v700_v46 = vadd.f32 %v698_v45, %v690_v44  ;;  %v1035_v44 = vld [vmem:[%s1802_s6 + $0x18] sm:$0xff] }
 0xd1f   :  { %1420 = vtanh.f32 %v700_v46 }
 0xd29   :  { %v1421_v47 = vpop.eup %1420 }
 0xd2a   :  { %703 = vrot.lane.b32.xlu1 %v1421_v47, %s1553_s11 }
 0xd9c   :  { %v704_v48 = vpop.permute.xlu1 %703 }
 0xd9d   :  { %v706_v49 = vmul.f32 %v1419_v41, %v704_v48  ;;  %v1033_v41 = vld [vmem:[%s1802_s6 + $0x8] sm:$0xff] }
 0xd9e   :  { %v1363_v43 = vpack.c.bf16 %v1033_v41, %v1032_v40 }
 0xd9f   :  { %708 = vrot.lane.b32.xlu0 %v706_v49, %s1554_s5 }
 0xda0   :  { %1364 = vmatprep.subr.bf16.mxu1 %v1363_v43 }
 0xe11   :  { %v709_v50 = vpop.permute.xlu0 %708 }
 0xe12   :  { %712 = vst.msk [vmem:[#allocation3 + $0x8] sm:$0x3] %vm291_vm3, %v709_v50  ;;  %1276 = vmatmul.mubr.msk.f32.vlgmr.msra.gmra.mrb[6].mxu0 %vm184_vm2, %v709_v50 }
 0xe13   :  { %1359 = vmatpush3.bf16.msra.mxu0 %v1668_v8  ;;  %1297 = vmatprep.mubr.msk.f32.mxu0 %vm1551_vm0, %v1552_v1 }
 0xe14   :  { %1360 = vmatprep.subr.bf16.mxu0 %v1550_v0 }
 0xe17   :  { %1362 = vmatpush3.bf16.msra.mxu0 %v1671_v12 }
 0xee5   :  { %v783_v52 = vpop.f32.mrb[6].mxu0 }
 0xee6   :  { %v787_v53 = vadd.f32 %v783_v52, %v714_v51  ;;  %v1277_v54 = vpop.f32.mrb[7].mxu0  ;;  %v1152_v51 = vld [vmem:[#allocation9] ss:$0 sm:$0xff] }
 0xee8   :  { %1422 = vtanh.f32 %v787_v53  ;;  %v1147_v56 = vmul.f32 -1.442695, %v787_v53 }
 0xeea   :  { %1424 = vpow2.f32 %v1147_v56 }
 0xef2   :  { %v1423_v55 = vpop.eup %1422 }
 0xef3   :  { %797 = vrot.lane.b32.xlu1 %v1423_v55, %s1553_s11 }
 0xef4   :  { %v1425_v57 = vpop.eup %1424 }
 0xef5   :  { %v791_v58 = vadd.f32 1.0, %v1425_v57 }
 0xef7   :  { %1426 = vrcp.f32 %v791_v58 }
 0xf01   :  { %v1427_v8 = vpop.eup %1426 }
 0xf02   :  { %v795_v0 = vmul.f32 %v1427_v8, %v700_v46  ;;  %v1367_v46 = vpack.c.bf16 %v1035_v44, %v1034_v42 }
 0xf65   :  { %v798_v59 = vpop.permute.xlu1 %797 }
 0xf66   :  { %v800_v1 = vmul.f32 %v1427_v8, %v798_v59 }
 0xf68   :  { %802 = vrot.lane.b32.xlu0 %v800_v1, %s1554_s5 }
 0xfda   :  { %v803_v12 = vpop.permute.xlu0 %802 }
 0xfdb   :  { %v805_v60 = vadd.f32 %v803_v12, %v795_v0 }
 0xfdd   :  { %1428 = vtanh.f32 %v805_v60 }
 0xfde   :  { %1430 = vtanh.f32 %v1028_v2 }
 0xfe7   :  { %v1429_v61 = vpop.eup %1428 }
 0xfe8   :  { %808 = vrot.lane.b32.xlu1 %v1429_v61, %s1553_s11  ;;  %v1431_v4 = vpop.eup %1430 }
0x105a   :  { %v809_v62 = vpop.permute.xlu1 %808 }
0x105b   :  { %v811_v63 = vmul.f32 %v1427_v8, %v809_v62 }
0x105d   :  { %813 = vrot.lane.b32.xlu0 %v811_v63, %s1554_s5 }
0x10cf   :  { %v814_v3 = vpop.permute.xlu0 %813 }
0x10d0   :  { %817 = vst.msk [vmem:[#allocation3 + $0xa] sm:$0x3] %vm291_vm3, %v814_v3  ;;  %1287 = vmatmul.mubr.msk.f32.vlgmr.msra.gmra.mrb[6].mxu1 %vm184_vm2, %v814_v3 }
0x10d1   :  { %1308 = vmatprep.mubr.msk.f32.mxu1 %vm184_vm2, %v1431_v4  ;;  %1366 = vmatpush3.bf16.msra.mxu1 %v1363_v43 }
0x10d2   :  { %1368 = vmatprep.subr.bf16.mxu1 %v1367_v46 }
0x10d5   :  { %1370 = vmatpush3.bf16.msra.mxu1 %v1367_v46 }
0x11a3   :  { %v888_v6 = vpop.f32.mrb[6].mxu1 }
0x11a4   :  { %v892_v7 = vadd.f32 %v888_v6, %v819_v5  ;;  %v1288_v9 = vpop.f32.mrb[7].mxu1 }
0x11a6   :  { %1432 = vtanh.f32 %v892_v7  ;;  %v1149_v11 = vmul.f32 -1.442695, %v892_v7 }
0x11a8   :  { %1434 = vpow2.f32 %v1149_v11 }
0x11b0   :  { %v1433_v10 = vpop.eup %1432 }
0x11b1   :  { %902 = vrot.lane.b32.xlu1 %v1433_v10, %s1553_s11 }
0x11b2   :  { %v1435_v13 = vpop.eup %1434 }
0x11b3   :  { %v896_v14 = vadd.f32 1.0, %v1435_v13 }
0x11b5   :  { %1436 = vrcp.f32 %v896_v14 }
0x11bf   :  { %v1437_v15 = vpop.eup %1436 }
0x11c0   :  { %v900_v18 = vmul.f32 %v1437_v15, %v805_v60 }
0x1223   :  { %v903_v16 = vpop.permute.xlu1 %902 }
0x1224   :  { %v905_v17 = vmul.f32 %v1437_v15, %v903_v16 }
0x1226   :  { %907 = vrot.lane.b32.xlu0 %v905_v17, %s1554_s5 }
0x1298   :  { %v908_v19 = vpop.permute.xlu0 %907 }
0x1299   :  { %v910_v20 = vadd.f32 %v908_v19, %v900_v18 }
0x129b   :  { %1438 = vtanh.f32 %v910_v20 }
0x12a5   :  { %v1439_v21 = vpop.eup %1438 }
0x12a6   :  { %913 = vrot.lane.b32.xlu1 %v1439_v21, %s1553_s11 }
0x1318   :  { %v914_v22 = vpop.permute.xlu1 %913 }
0x1319   :  { %v916_v23 = vmul.f32 %v1437_v15, %v914_v22 }
0x131b   :  { %918 = vrot.lane.b32.xlu0 %v916_v23, %s1554_s5 }
0x138d   :  { %v919_v24 = vpop.permute.xlu0 %918 }
0x138e   :  { %922 = vst.msk [vmem:[#allocation3 + $0xc] sm:$0x3] %vm291_vm3, %v919_v24  ;;  %1298 = vmatmul.mubr.msk.f32.vlgmr.msra.gmra.mrb[8].mxu0 %vm184_vm2, %v919_v24 }
0x1461   :  { %v993_v26 = vpop.f32.mrb[8].mxu0 }
0x1462   :  { %v997_v27 = vadd.f32 %v993_v26, %v924_v25  ;;  %v1299_v28 = vpop.f32.mrb[9].mxu0 }
0x1464   :  { %1440 = vtanh.f32 %v997_v27  ;;  %v1151_v30 = vmul.f32 -1.442695, %v997_v27 }
0x1466   :  { %1442 = vpow2.f32 %v1151_v30 }
0x146e   :  { %v1441_v29 = vpop.eup %1440 }
0x146f   :  { %1007 = vrot.lane.b32.xlu1 %v1441_v29, %s1553_s11 }
0x1470   :  { %v1443_v31 = vpop.eup %1442 }
0x1471   :  { %v1001_v32 = vadd.f32 1.0, %v1443_v31 }
0x1473   :  { %1444 = vrcp.f32 %v1001_v32 }
0x147d   :  { %v1445_v33 = vpop.eup %1444 }
0x147e   :  { %v1005_v36 = vmul.f32 %v1445_v33, %v910_v20 }
0x14e1   :  { %v1008_v34 = vpop.permute.xlu1 %1007 }
0x14e2   :  { %v1010_v35 = vmul.f32 %v1445_v33, %v1008_v34 }
0x14e4   :  { %1012 = vrot.lane.b32.xlu0 %v1010_v35, %s1554_s5 }
0x1556   :  { %v1013_v37 = vpop.permute.xlu0 %1012 }
0x1557   :  { %v1015_v38 = vadd.f32 %v1013_v37, %v1005_v36 }
0x1559   :  { %1446 = vtanh.f32 %v1015_v38 }
0x1563   :  { %v1447_v39 = vpop.eup %1446 }
0x1564   :  { %1018 = vrot.lane.b32.xlu1 %v1447_v39, %s1553_s11 }
0x15d6   :  { %v1019_v45 = vpop.permute.xlu1 %1018 }
0x15d7   :  { %v1021_v47 = vmul.f32 %v1445_v33, %v1019_v45 }
0x15d9   :  { %1023 = vrot.lane.b32.xlu0 %v1021_v47, %s1554_s5 }
0x164b   :  { %v1024_v48 = vpop.permute.xlu0 %1023 }
0x164c   :  { %1027 = vst.msk [vmem:[#allocation3 + $0xe] sm:$0x3] %vm291_vm3, %v1024_v48 }
0x1653   :  { %v1029_v49 = vld [vmem:[#allocation3 + $0x8] sm:$0xff] }
0x1654   :  { %1448 = vtanh.f32 %v1029_v49 }
0x165e   :  { %v1449_v50 = vpop.eup %1448 }
0x165f   :  { %1309 = vmatmul.mubr.msk.f32.vlgmr.msra.gmra.mrb[8].mxu1 %vm184_vm2, %v1449_v50 }
0x1732   :  { %v1310_v52 = vpop.f32.mrb[8].mxu1 }
0x1733   :  { %v1121_v53 = vadd.f32 %v1310_v52, %v1152_v51  ;;  %v1115_v54 = vpop.f32.mrb[9].mxu1 }
0x1734   :  { %v1116_v55 = vadd.f32 %v1152_v51, %v1115_v54 }
0x1735   :  { %1125 = vst [vmem:[%s1804_s8 + $0x8] sm:$0xff] %v1121_v53 }
0x1736   :  { %1124 = vst [vmem:[%s1804_s8] sm:$0xff] %v1116_v55 }
0x1737   :  { %1130 = vsyncpa [#allocation5], 1 }
0x1738   :  { %1131 = vsyncpa [#allocation7], 1 }
0x1739   :  { %1132 = vsyncpa [#allocation10], 1 }

</bundles_post_ra>
